<compile_context>
chip_gen: v7x
topology: tpu7x:2x2x1
jax: 0.10.0
libtpu: 0.0.40
codegen_flags: <defaults>
</compile_context>

<pallas_src>
import functools

import jax
import jax.numpy as jnp
from jax import lax
from jax.experimental import pallas as pl
from jax.experimental.pallas import tpu as pltpu


def _round_up(a, m):
    return (a + m - 1) // m * m


def _vmem_limit_bytes():
    """Generation-aware scoped-VMEM limit (v7x: 64 MiB phys, v5e/v6e: 128 MiB)."""
    try:
        cap = int(pltpu.get_tpu_info().vmem_capacity_bytes)
    except Exception:
        cap = 128 * 1024 * 1024
    return max(32 * 1024 * 1024, min(96 * 1024 * 1024, cap * 3 // 4))


def _contract_taps(xm_ref, xh_ref, w_ref, *, k, Wp, tile, stacked):
    """One (rows, tile) contraction over the k*k conv taps.

    Layout: channels on sublanes, flattened padded pixels on lanes.
      xm_ref : (1, C, tile)    main pixel tile (bf16)
      xh_ref : (1, C, halo_l)  halo lanes immediately after the main tile (bf16)
      w_ref  : folded weights, (rows, k*k*C) if stacked else (k*k, rows, C)
    Returns (rows, tile) float32.
    """
    shifts = [(s // k) * Wp + (s % k) for s in range(k * k)]
    xt = jnp.concatenate([xm_ref[0], xh_ref[0]], axis=1)       # (C, tile+halo_l)
    taps = [xt[:, sh:sh + tile] for sh in shifts]              # k*k x (C, tile)
    if stacked:
        # Deep im2col contraction: sublane-aligned concat (C % 16 == 0 in bf16).
        slab = jnp.concatenate(taps, axis=0)                   # (k*k*C, tile)
        return jnp.dot(w_ref[...], slab, preferred_element_type=jnp.float32)
    acc = None
    for s, xs in enumerate(taps):
        d = jnp.dot(w_ref[s], xs, preferred_element_type=jnp.float32)
        acc = d if acc is None else acc + d
    return acc


def _conv_stats_kernel(xm_ref, xh_ref, w_ref, mask_ref, packed_ref, stats_ref,
                       *, k, Wp, tile, co, stacked):
    # activation=True path: folded conv -> packed [y ; avg] rows (bf16) plus
    # per-(image, tile) BatchNorm partial statistics over valid pixels (f32).
    packed = _contract_taps(xm_ref, xh_ref, w_ref,
                            k=k, Wp=Wp, tile=tile, stacked=stacked)  # (rows, tile) f32
    y = packed[:co]                                            # (co, tile)
    m = mask_ref[...]                                          # (1, tile) 0/1
    ym = y * m
    s1 = jnp.sum(ym, axis=1, keepdims=True)                    # (co, 1) sum
    s2 = jnp.sum(ym * y, axis=1, keepdims=True)                # (co, 1) sum sq
    stats_ref[0, 0] = jnp.concatenate([s1, s2], axis=1)        # (co, 2)
    packed_ref[0] = packed.astype(packed_ref.dtype)


def _conv_fused_kernel(xm_ref, xh_ref, w_ref, bias_ref, out_ref,
                       *, k, Wp, tile, stacked):
    # activation=False path: fully fused (add_mean pre-folded into weights).
    y = _contract_taps(xm_ref, xh_ref, w_ref,
                       k=k, Wp=Wp, tile=tile, stacked=stacked)
    out_ref[0] = y + bias_ref[...]


def _bn_act_kernel(packed_ref, scale_ref, shift_ref, eo_ref, out_ref,
                   *, co, add_mean):
    # Folded BatchNorm (per-channel scale/shift) + leaky_relu (+ add_mean).
    pk = packed_ref[0]                                         # (co+um, tile) bf16
    y = pk[:co].astype(jnp.float32) * scale_ref[...] + shift_ref[...]
    y = jnp.where(y > 0, y, 0.01 * y)
    if add_mean:
        y = y + jnp.dot(eo_ref[...], pk[co:], preferred_element_type=jnp.float32)
    out_ref[0] = y


def mean_layer_forward(x, weight, bias, gamma, beta, *, kernel_size, um_dim,
                       activation=True, add_mean=True, eps=1e-5,
                       pixel_tile=2048):
    B, C, H, W = x.shape
    Co = weight.shape[0]
    k = kernel_size
    p = (k - 1) // 2
    um = um_dim
    G = C // um
    assert C % um == 0 and Co % um == 0

    Hp, Wp = H + 2 * p, W + 2 * p
    Npp = Hp * Wp                          # real padded-image lanes
    N_out = H * Wp                         # output lanes we compute/store
    halo = (k - 1) * (Wp + 1)              # max static tap shift
    halo_l = _round_up(max(halo, 1), 128)  # halo block width (lane multiple)
    tile = _round_up(max(1, min(pixel_tile, N_out)), halo_l)  # lane tile
    T = -(-N_out // tile)                  # number of pixel tiles
    Nout_pad = T * tile
    Ntot = Nout_pad + halo_l               # input lane width (128 multiple)

    f32 = jnp.float32
    w32 = weight.astype(f32)               # (Co, C, kh, kw)

    # ---- glue: replicate-pad, flatten pixels to lanes, zero lane tail -----
    xp = jnp.pad(x.astype(f32), ((0, 0), (0, 0), (p, p), (p, p)), mode="edge")
    xpf = jnp.pad(xp.reshape(B, C, Npp),
                  ((0, 0), (0, 0), (0, Ntot - Npp))).astype(jnp.bfloat16)

    # ---- glue: trace-time weight folding ----------------------------------
    # wk[s=ki*k+kj, o, c] = weight[o, c, kj, ki]  (the module's transpose trick)
    wk = jnp.transpose(w32, (3, 2, 0, 1)).reshape(k * k, Co, C)
    # per-pixel group mean: avg = sel @ (sum of the k*k shifted taps)
    sel = ((jnp.arange(C)[None, :] % um) == jnp.arange(um)[:, None]
           ).astype(f32) / float(G * k * k)                     # (um, C)
    # mean subtraction folded through the conv:  y -= (cw @ sel) @ x_taps
    cw = w32.sum(axis=(2, 3)).reshape(Co, G, um).sum(axis=1)    # (Co, um)
    # add_mean re-expansion:  out[o] += avg[o % um]
    eo = ((jnp.arange(Co)[:, None] % um) == jnp.arange(um)[None, :]
          ).astype(f32)                                         # (Co, um)

    if activation:
        # bias dropped: training-mode BatchNorm cancels a per-channel constant.
        wfold = wk - jnp.dot(cw, sel)[None]                     # (k*k, Co, C)
        waug = jnp.concatenate(
            [wfold, jnp.broadcast_to(sel[None], (k * k, um, C))], axis=1)
        rows = Co + um                                          # [y ; avg] rows
    else:
        corr = (cw - eo) if add_mean else cw
        waug = wk - jnp.dot(corr, sel)[None]                    # (k*k, Co, C)
        rows = Co

    # Single deep C*k*k contraction when channels align to the bf16 sublane
    # tile (sublane-aligned concat); otherwise per-tap dots w/ f32 accumulate.
    stacked = (C % 16 == 0)
    if stacked:
        w_arg = jnp.transpose(waug, (1, 0, 2)).reshape(rows, k * k * C)
        w_spec = pl.BlockSpec((rows, k * k * C), lambda b, t: (0, 0))
    else:
        w_arg = waug
        w_spec = pl.BlockSpec((k * k, rows, C), lambda b, t: (0, 0, 0))
    w_arg = w_arg.astype(jnp.bfloat16)

    grid = (B, T)
    cparams = pltpu.CompilerParams(
        dimension_semantics=("parallel", "parallel"),
        vmem_limit_bytes=_vmem_limit_bytes(),
    )

    hb = tile // halo_l
    xm_spec = pl.BlockSpec((1, C, tile), lambda b, t: (b, 0, t))
    xh_spec = pl.BlockSpec((1, C, halo_l), lambda b, t: (b, 0, (t + 1) * hb))
    col_spec = pl.BlockSpec((Co, 1), lambda b, t: (0, 0))
    out_spec = pl.BlockSpec((1, Co, tile), lambda b, t: (b, 0, t))

    if not activation:
        out_t = pl.pallas_call(
            functools.partial(_conv_fused_kernel, k=k, Wp=Wp, tile=tile,
                              stacked=stacked),
            out_shape=jax.ShapeDtypeStruct((B, Co, Nout_pad), f32),
            grid=grid,
            in_specs=[xm_spec, xh_spec, w_spec, col_spec],
            out_specs=out_spec,
            compiler_params=cparams,
        )(xpf, xpf, w_arg, bias.astype(f32).reshape(Co, 1))
    else:
        # valid (non-padding) lanes for the BatchNorm batch statistics
        q = jnp.arange(Nout_pad)
        mask = ((q < N_out) & ((q % Wp) < W)).astype(f32).reshape(1, Nout_pad)

        packed_spec = pl.BlockSpec((1, rows, tile), lambda b, t: (b, 0, t))
        packed_t, stats = pl.pallas_call(
            functools.partial(_conv_stats_kernel, k=k, Wp=Wp, tile=tile, co=Co,
                              stacked=stacked),
            out_shape=(jax.ShapeDtypeStruct((B, rows, Nout_pad), jnp.bfloat16),
                       jax.ShapeDtypeStruct((B, T, Co, 2), f32)),
            grid=grid,
            in_specs=[xm_spec, xh_spec, w_spec,
                      pl.BlockSpec((1, tile), lambda b, t: (0, t))],
            out_specs=(packed_spec,
                       pl.BlockSpec((1, 1, Co, 2), lambda b, t: (b, t, 0, 0))),
            compiler_params=cparams,
        )(xpf, xpf, w_arg, mask)

        # BatchNorm2d training-mode batch statistics: tiny XLA reduction.
        n_valid = float(B * H * W)
        tot = stats.sum(axis=(0, 1))                             # (Co, 2)
        mean = tot[:, 0] / n_valid
        var = jnp.maximum(tot[:, 1] / n_valid - mean * mean, 0.0)
        # TODO(synk): shifted second moment if channel means can be very large.
        scale = gamma.astype(f32) / jnp.sqrt(var + eps)
        shift = beta.astype(f32) - mean * scale

        # Folded BN + leaky_relu (+ add_mean) on the packed bf16 intermediate.
        # NOTE: input_output_aliases is not applicable -- the bf16 (Co+um)-row
        # input and the f32 Co-row output differ in shape and dtype.
        out_t = pl.pallas_call(
            functools.partial(_bn_act_kernel, co=Co, add_mean=add_mean),
            out_shape=jax.ShapeDtypeStruct((B, Co, Nout_pad), f32),
            grid=grid,
            in_specs=[packed_spec, col_spec, col_spec,
                      pl.BlockSpec((Co, um), lambda b, t: (0, 0))],
            out_specs=out_spec,
            compiler_params=cparams,
        )(packed_t, scale.reshape(Co, 1), shift.reshape(Co, 1),
          eo.astype(jnp.bfloat16))

    # Bottom pad rows were never computed; only the lane tail and the
    # replicate-padding columns remain to crop.
    out = out_t[:, :, :N_out].reshape(B, Co, H, Wp)[:, :, :, :W]
    return out


def _reference_forward(x, weight, bias, gamma, beta, *, kernel_size, um_dim,
                       activation=True, add_mean=True, eps=1e-5):
    """Pure-JAX (f32) transcription of the PyTorch forward, for verification."""
    B, C, H, W = x.shape
    k = kernel_size
    p = (k - 1) // 2
    um = um_dim
    Co = weight.shape[0]
    xp = jnp.pad(x, ((0, 0), (0, 0), (p, p), (p, p)), mode="edge")
    pat = jnp.stack([jnp.stack([xp[:, :, i:i + H, j:j + W] for j in range(k)], axis=2)
                     for i in range(k)], axis=2)        # (B, C, ki, kj, H, W)
    pat7 = pat.reshape(B, C // um, um, k, k, H, W)
    avgs = pat7.mean(axis=(1, 3, 4), keepdims=True)      # (B,1,um,1,1,H,W)
    cen = (pat7 - avgs).reshape(B, C, k, k, H, W)
    t = jnp.transpose(cen, (0, 1, 4, 3, 5, 2))           # (B, C, H, kj, W, ki)
    inp = t.reshape(B, C, H * k, W * k)
    out = lax.conv_general_dilated(inp, weight, (k, k), "VALID",
                                   dimension_numbers=("NCHW", "OIHW", "NCHW"))
    out = out + bias[None, :, None, None]
    if activation:
        mean = out.mean(axis=(0, 2, 3), keepdims=True)
        var = out.var(axis=(0, 2, 3), keepdims=True)
        out = (out - mean) / jnp.sqrt(var + eps) * gamma[None, :, None, None] \
            + beta[None, :, None, None]
        out = jnp.where(out > 0, out, 0.01 * out)
    if add_mean:
        avg2 = avgs.reshape(B, 1, um, H, W)
        out = out.reshape(B, Co // um, um, H, W) + avg2
        out = out.reshape(B, Co, H, W)
    return out


if __name__ == "__main__":
    key = jax.random.PRNGKey(0)

    def make_inputs(key, B, Ci, Cout, H, W, ks):
        kx, kw, kb = jax.random.split(key, 3)
        x = jax.random.normal(kx, (B, Ci, H, W), jnp.float32)
        bound = 1.0 / ((Ci * ks * ks) ** 0.5)
        weight = jax.random.uniform(kw, (Cout, Ci, ks, ks), jnp.float32, -bound, bound)
        bias = jax.random.uniform(kb, (Cout,), jnp.float32, -bound, bound)
        gamma = jnp.ones((Cout,), jnp.float32)   # BatchNorm2d default init
        beta = jnp.zeros((Cout,), jnp.float32)
        return x, weight, bias, gamma, beta

    # bf16 matmuls / bf16 intermediates -> bf16-level comparison tolerance.
    tol = dict(rtol=2e-2, atol=1e-2)
    k1, k2 = jax.random.split(key)

    # 1) default path (BN + leaky_relu + add_mean); small pixel_tile to
    #    exercise the multi-tile halo indexing (3 pixel tiles per image).
    x, w, b, g, bt = make_inputs(k1, 2, 4, 8, 16, 16, 3)
    out = mean_layer_forward(x, w, b, g, bt, kernel_size=3, um_dim=2,
                             pixel_tile=128)
    out = jax.block_until_ready(out)
    assert out.shape == (2, 8, 16, 16)
    ref = _reference_forward(x, w, b, g, bt, kernel_size=3, um_dim=2)
    assert jnp.allclose(out, ref, **tol), "mismatch (activation=True)"

    # 2) fully fused single-kernel path: activation=False, add_mean=True.
    out2 = mean_layer_forward(x, w, b, g, bt, kernel_size=3, um_dim=2,
                              activation=False, add_mean=True)
    out2 = jax.block_until_ready(out2)
    ref2 = _reference_forward(x, w, b, g, bt, kernel_size=3, um_dim=2,
                              activation=False, add_mean=True)
    assert jnp.allclose(out2, ref2, **tol), "mismatch (activation=False)"

    # 3) channel count aligned to the bf16 sublane tile -> single stacked
    #    C*k*k contraction path; also covers add_mean=False.
    x3, w3, b3, g3, bt3 = make_inputs(k2, 2, 16, 16, 12, 12, 3)
    out3 = mean_layer_forward(x3, w3, b3, g3, bt3, kernel_size=3, um_dim=4,
                              add_mean=False)
    out3 = jax.block_until_ready(out3)
    ref3 = _reference_forward(x3, w3, b3, g3, bt3, kernel_size=3, um_dim=4,
                              add_mean=False)
    assert jnp.allclose(out3, ref3, **tol), "mismatch (stacked path)"

    print("KERNEL_OK")
</pallas_src>

<mosaic_0001>
module attributes {stable_mosaic.version = 11 : i64} {
  func.func @_conv_stats_kernel(%arg0: i32, %arg1: i32, %arg2: memref<1x4x128xbf16, #tpu.memory_space<vmem>>, %arg3: memref<1x4x128xbf16, #tpu.memory_space<vmem>>, %arg4: memref<9x10x4xbf16, #tpu.memory_space<vmem>>, %arg5: memref<1x128xf32, #tpu.memory_space<vmem>>, %arg6: memref<1x10x128xbf16, #tpu.memory_space<vmem>>, %arg7: memref<1x1x8x2xf32, #tpu.memory_space<vmem>>) attributes {dimension_semantics = [#tpu.dimension_semantics<parallel>, #tpu.dimension_semantics<parallel>], iteration_bounds = array<i64: 2, 3>, scalar_prefetch = 0 : i64, scratch_operands = 0 : i64, tpu.core_type = #tpu.core_type<tc>, window_params = [{transform_indices = @transform_0, window_bounds = array<i64: 1, 4, 128>}, {transform_indices = @transform_1, window_bounds = array<i64: 1, 4, 128>}, {pipeline_mode = #tpu.pipeline_mode<synchronous>, transform_indices = @transform_2, window_bounds = array<i64: 9, 10, 4>}, {transform_indices = @transform_3, window_bounds = array<i64: 1, 128>}, {transform_indices = @transform_4, window_bounds = array<i64: 1, 10, 128>}, {transform_indices = @transform_5, window_bounds = array<i64: 1, 1, 8, 2>}]} {
    %c0 = arith.constant 0 : index
    %c0_0 = arith.constant 0 : index
    %c0_1 = arith.constant 0 : index
    %0 = vector.load %arg2[%c0, %c0_0, %c0_1] : memref<1x4x128xbf16, #tpu.memory_space<vmem>>, vector<1x4x128xbf16>
    %1 = vector.shape_cast %0 : vector<1x4x128xbf16> to vector<4x128xbf16>
    %c0_2 = arith.constant 0 : index
    %c0_3 = arith.constant 0 : index
    %c0_4 = arith.constant 0 : index
    %2 = vector.load %arg3[%c0_2, %c0_3, %c0_4] : memref<1x4x128xbf16, #tpu.memory_space<vmem>>, vector<1x4x128xbf16>
    %3 = vector.shape_cast %2 : vector<1x4x128xbf16> to vector<4x128xbf16>
    %4 = tpu.concatenate %1, %3 in 1 : vector<4x128xbf16>, vector<4x128xbf16> -> vector<4x256xbf16>
    %5 = vector.extract_strided_slice %4 {offsets = [0, 0], sizes = [4, 128], strides = [1, 1]} : vector<4x256xbf16> to vector<4x128xbf16>
    %6 = vector.extract_strided_slice %4 {offsets = [0, 1], sizes = [4, 128], strides = [1, 1]} : vector<4x256xbf16> to vector<4x128xbf16>
    %7 = vector.extract_strided_slice %4 {offsets = [0, 2], sizes = [4, 128], strides = [1, 1]} : vector<4x256xbf16> to vector<4x128xbf16>
    %8 = vector.extract_strided_slice %4 {offsets = [0, 18], sizes = [4, 128], strides = [1, 1]} : vector<4x256xbf16> to vector<4x128xbf16>
    %9 = vector.extract_strided_slice %4 {offsets = [0, 19], sizes = [4, 128], strides = [1, 1]} : vector<4x256xbf16> to vector<4x128xbf16>
    %10 = vector.extract_strided_slice %4 {offsets = [0, 20], sizes = [4, 128], strides = [1, 1]} : vector<4x256xbf16> to vector<4x128xbf16>
    %11 = vector.extract_strided_slice %4 {offsets = [0, 36], sizes = [4, 128], strides = [1, 1]} : vector<4x256xbf16> to vector<4x128xbf16>
    %12 = vector.extract_strided_slice %4 {offsets = [0, 37], sizes = [4, 128], strides = [1, 1]} : vector<4x256xbf16> to vector<4x128xbf16>
    %13 = vector.extract_strided_slice %4 {offsets = [0, 38], sizes = [4, 128], strides = [1, 1]} : vector<4x256xbf16> to vector<4x128xbf16>
    %c0_5 = arith.constant 0 : index
    %c0_6 = arith.constant 0 : index
    %c0_7 = arith.constant 0 : index
    %14 = vector.load %arg4[%c0_5, %c0_6, %c0_7] : memref<9x10x4xbf16, #tpu.memory_space<vmem>>, vector<1x10x4xbf16>
    %15 = vector.shape_cast %14 : vector<1x10x4xbf16> to vector<10x4xbf16>
    %cst = arith.constant dense<0.000000e+00> : vector<10x128xf32>
    %16 = tpu.matmul %15, %5, %cst {dimension_numbers = #tpu.dot_dimension_numbers<[1], [0], [0], [1], [0, 0, 1, 1], [], []>} : vector<10x4xbf16>, vector<4x128xbf16>, vector<10x128xf32> -> vector<10x128xf32>
    %c1 = arith.constant 1 : index
    %c0_8 = arith.constant 0 : index
    %c0_9 = arith.constant 0 : index
    %17 = vector.load %arg4[%c1, %c0_8, %c0_9] : memref<9x10x4xbf16, #tpu.memory_space<vmem>>, vector<1x10x4xbf16>
    %18 = vector.shape_cast %17 : vector<1x10x4xbf16> to vector<10x4xbf16>
    %cst_10 = arith.constant dense<0.000000e+00> : vector<10x128xf32>
    %19 = tpu.matmul %18, %6, %cst_10 {dimension_numbers = #tpu.dot_dimension_numbers<[1], [0], [0], [1], [0, 0, 1, 1], [], []>} : vector<10x4xbf16>, vector<4x128xbf16>, vector<10x128xf32> -> vector<10x128xf32>
    %20 = arith.addf %16, %19 : vector<10x128xf32>
    %c2 = arith.constant 2 : index
    %c0_11 = arith.constant 0 : index
    %c0_12 = arith.constant 0 : index
    %21 = vector.load %arg4[%c2, %c0_11, %c0_12] : memref<9x10x4xbf16, #tpu.memory_space<vmem>>, vector<1x10x4xbf16>
    %22 = vector.shape_cast %21 : vector<1x10x4xbf16> to vector<10x4xbf16>
    %cst_13 = arith.constant dense<0.000000e+00> : vector<10x128xf32>
    %23 = tpu.matmul %22, %7, %cst_13 {dimension_numbers = #tpu.dot_dimension_numbers<[1], [0], [0], [1], [0, 0, 1, 1], [], []>} : vector<10x4xbf16>, vector<4x128xbf16>, vector<10x128xf32> -> vector<10x128xf32>
    %24 = arith.addf %20, %23 : vector<10x128xf32>
    %c3 = arith.constant 3 : index
    %c0_14 = arith.constant 0 : index
    %c0_15 = arith.constant 0 : index
    %25 = vector.load %arg4[%c3, %c0_14, %c0_15] : memref<9x10x4xbf16, #tpu.memory_space<vmem>>, vector<1x10x4xbf16>
    %26 = vector.shape_cast %25 : vector<1x10x4xbf16> to vector<10x4xbf16>
    %cst_16 = arith.constant dense<0.000000e+00> : vector<10x128xf32>
    %27 = tpu.matmul %26, %8, %cst_16 {dimension_numbers = #tpu.dot_dimension_numbers<[1], [0], [0], [1], [0, 0, 1, 1], [], []>} : vector<10x4xbf16>, vector<4x128xbf16>, vector<10x128xf32> -> vector<10x128xf32>
    %28 = arith.addf %24, %27 : vector<10x128xf32>
    %c4 = arith.constant 4 : index
    %c0_17 = arith.constant 0 : index
    %c0_18 = arith.constant 0 : index
    %29 = vector.load %arg4[%c4, %c0_17, %c0_18] : memref<9x10x4xbf16, #tpu.memory_space<vmem>>, vector<1x10x4xbf16>
    %30 = vector.shape_cast %29 : vector<1x10x4xbf16> to vector<10x4xbf16>
    %cst_19 = arith.constant dense<0.000000e+00> : vector<10x128xf32>
    %31 = tpu.matmul %30, %9, %cst_19 {dimension_numbers = #tpu.dot_dimension_numbers<[1], [0], [0], [1], [0, 0, 1, 1], [], []>} : vector<10x4xbf16>, vector<4x128xbf16>, vector<10x128xf32> -> vector<10x128xf32>
    %32 = arith.addf %28, %31 : vector<10x128xf32>
    %c5 = arith.constant 5 : index
    %c0_20 = arith.constant 0 : index
    %c0_21 = arith.constant 0 : index
    %33 = vector.load %arg4[%c5, %c0_20, %c0_21] : memref<9x10x4xbf16, #tpu.memory_space<vmem>>, vector<1x10x4xbf16>
    %34 = vector.shape_cast %33 : vector<1x10x4xbf16> to vector<10x4xbf16>
    %cst_22 = arith.constant dense<0.000000e+00> : vector<10x128xf32>
    %35 = tpu.matmul %34, %10, %cst_22 {dimension_numbers = #tpu.dot_dimension_numbers<[1], [0], [0], [1], [0, 0, 1, 1], [], []>} : vector<10x4xbf16>, vector<4x128xbf16>, vector<10x128xf32> -> vector<10x128xf32>
    %36 = arith.addf %32, %35 : vector<10x128xf32>
    %c6 = arith.constant 6 : index
    %c0_23 = arith.constant 0 : index
    %c0_24 = arith.constant 0 : index
    %37 = vector.load %arg4[%c6, %c0_23, %c0_24] : memref<9x10x4xbf16, #tpu.memory_space<vmem>>, vector<1x10x4xbf16>
    %38 = vector.shape_cast %37 : vector<1x10x4xbf16> to vector<10x4xbf16>
    %cst_25 = arith.constant dense<0.000000e+00> : vector<10x128xf32>
    %39 = tpu.matmul %38, %11, %cst_25 {dimension_numbers = #tpu.dot_dimension_numbers<[1], [0], [0], [1], [0, 0, 1, 1], [], []>} : vector<10x4xbf16>, vector<4x128xbf16>, vector<10x128xf32> -> vector<10x128xf32>
    %40 = arith.addf %36, %39 : vector<10x128xf32>
    %c7 = arith.constant 7 : index
    %c0_26 = arith.constant 0 : index
    %c0_27 = arith.constant 0 : index
    %41 = vector.load %arg4[%c7, %c0_26, %c0_27] : memref<9x10x4xbf16, #tpu.memory_space<vmem>>, vector<1x10x4xbf16>
    %42 = vector.shape_cast %41 : vector<1x10x4xbf16> to vector<10x4xbf16>
    %cst_28 = arith.constant dense<0.000000e+00> : vector<10x128xf32>
    %43 = tpu.matmul %42, %12, %cst_28 {dimension_numbers = #tpu.dot_dimension_numbers<[1], [0], [0], [1], [0, 0, 1, 1], [], []>} : vector<10x4xbf16>, vector<4x128xbf16>, vector<10x128xf32> -> vector<10x128xf32>
    %44 = arith.addf %40, %43 : vector<10x128xf32>
    %c8 = arith.constant 8 : index
    %c0_29 = arith.constant 0 : index
    %c0_30 = arith.constant 0 : index
    %45 = vector.load %arg4[%c8, %c0_29, %c0_30] : memref<9x10x4xbf16, #tpu.memory_space<vmem>>, vector<1x10x4xbf16>
    %46 = vector.shape_cast %45 : vector<1x10x4xbf16> to vector<10x4xbf16>
    %cst_31 = arith.constant dense<0.000000e+00> : vector<10x128xf32>
    %47 = tpu.matmul %46, %13, %cst_31 {dimension_numbers = #tpu.dot_dimension_numbers<[1], [0], [0], [1], [0, 0, 1, 1], [], []>} : vector<10x4xbf16>, vector<4x128xbf16>, vector<10x128xf32> -> vector<10x128xf32>
    %48 = arith.addf %44, %47 : vector<10x128xf32>
    %49 = vector.extract_strided_slice %48 {offsets = [0, 0], sizes = [8, 128], strides = [1, 1]} : vector<10x128xf32> to vector<8x128xf32>
    %c0_32 = arith.constant 0 : index
    %c0_33 = arith.constant 0 : index
    %50 = vector.load %arg5[%c0_32, %c0_33] : memref<1x128xf32, #tpu.memory_space<vmem>>, vector<1x128xf32>
    %51 = vector.broadcast %50 : vector<1x128xf32> to vector<8x128xf32>
    %52 = arith.mulf %49, %51 : vector<8x128xf32>
    %cst_34 = arith.constant dense<0.000000e+00> : vector<8xf32>
    %53 = vector.multi_reduction <add>, %52, %cst_34 [1] : vector<8x128xf32> to vector<8xf32>
    %54 = vector.shape_cast %53 : vector<8xf32> to vector<8x1xf32>
    %55 = arith.mulf %52, %49 : vector<8x128xf32>
    %cst_35 = arith.constant dense<0.000000e+00> : vector<8xf32>
    %56 = vector.multi_reduction <add>, %55, %cst_35 [1] : vector<8x128xf32> to vector<8xf32>
    %57 = vector.shape_cast %56 : vector<8xf32> to vector<8x1xf32>
    %58 = tpu.concatenate %54, %57 in 1 : vector<8x1xf32>, vector<8x1xf32> -> vector<8x2xf32>
    %c0_36 = arith.constant 0 : index
    %c0_37 = arith.constant 0 : index
    %c0_38 = arith.constant 0 : index
    %c0_39 = arith.constant 0 : index
    %59 = vector.load %arg7[%c0_36, %c0_37, %c0_38, %c0_39] : memref<1x1x8x2xf32, #tpu.memory_space<vmem>>, vector<1x1x8x2xf32>
    %60 = vector.shape_cast %59 : vector<1x1x8x2xf32> to vector<8x2xf32>
    %61 = vector.shape_cast %58 : vector<8x2xf32> to vector<1x1x8x2xf32>
    tpu.vector_store %arg7[%c0_36, %c0_37, %c0_38, %c0_39], %61 {strides = array<i32>} : memref<1x1x8x2xf32, #tpu.memory_space<vmem>>, vector<1x1x8x2xf32>,
    %62 = arith.truncf %48 : vector<10x128xf32> to vector<10x128xbf16>
    %c0_40 = arith.constant 0 : index
    %c0_41 = arith.constant 0 : index
    %c0_42 = arith.constant 0 : index
    %63 = vector.load %arg6[%c0_40, %c0_41, %c0_42] : memref<1x10x128xbf16, #tpu.memory_space<vmem>>, vector<1x10x128xbf16>
    %64 = vector.shape_cast %63 : vector<1x10x128xbf16> to vector<10x128xbf16>
    %65 = vector.shape_cast %62 : vector<10x128xbf16> to vector<1x10x128xbf16>
    tpu.vector_store %arg6[%c0_40, %c0_41, %c0_42], %65 {strides = array<i32>} : memref<1x10x128xbf16, #tpu.memory_space<vmem>>, vector<1x10x128xbf16>,
    return
  }
  func.func @transform_0(%arg0: i32, %arg1: i32) -> (i32, i32, i32) {
    %c0_i32 = arith.constant 0 : i32
    %c0_i32_0 = arith.constant 0 : i32
    return %arg0, %c0_i32, %arg1 : i32, i32, i32
  }
  func.func @transform_1(%arg0: i32, %arg1: i32) -> (i32, i32, i32) {
    %c1_i32 = arith.constant 1 : i32
    %0 = arith.addi %arg1, %c1_i32 : i32
    %c1_i32_0 = arith.constant 1 : i32
    %1 = arith.muli %0, %c1_i32_0 : i32
    %c0_i32 = arith.constant 0 : i32
    %c0_i32_1 = arith.constant 0 : i32
    return %arg0, %c0_i32, %1 : i32, i32, i32
  }
  func.func @transform_2(%arg0: i32, %arg1: i32) -> (i32, i32, i32) {
    %c0_i32 = arith.constant 0 : i32
    %c0_i32_0 = arith.constant 0 : i32
    %c0_i32_1 = arith.constant 0 : i32
    %c0_i32_2 = arith.constant 0 : i32
    return %c0_i32, %c0_i32_0, %c0_i32_1 : i32, i32, i32
  }
  func.func @transform_3(%arg0: i32, %arg1: i32) -> (i32, i32) {
    %c0_i32 = arith.constant 0 : i32
    %c0_i32_0 = arith.constant 0 : i32
    return %c0_i32, %arg1 : i32, i32
  }
  func.func @transform_4(%arg0: i32, %arg1: i32) -> (i32, i32, i32) {
    %c0_i32 = arith.constant 0 : i32
    %c0_i32_0 = arith.constant 0 : i32
    return %arg0, %c0_i32, %arg1 : i32, i32, i32
  }
  func.func @transform_5(%arg0: i32, %arg1: i32) -> (i32, i32, i32, i32) {
    %c0_i32 = arith.constant 0 : i32
    %c0_i32_0 = arith.constant 0 : i32
    %c0_i32_1 = arith.constant 0 : i32
    return %arg0, %arg1, %c0_i32, %c0_i32_0 : i32, i32, i32, i32
  }
}

</mosaic_0001>

<bundles_post_ra>
// kernel: tpu_custom_call.1
= control target key start
LH: loop header
LB: loop body
LE: loop exit
PB: predicated region body
PF: predicated region fallthrough
CT: control target
= control target key end

     0   :  { %s2380_s0 = inlined_call_operand.hbm [shape: bf16[2,4,512], index: 0, kind: input, shape index: {}]   ;;  %s2381_s1 = inlined_call_operand.hbm [shape: bf16[2,4,512], index: 1, kind: input, shape index: {}]   ;;  %s2382_s2 = inlined_call_operand.hbm [shape: bf16[9,10,4], index: 2, kind: input, shape index: {}]   ;;  %s2383_s3 = inlined_call_operand.hbm [shape: f32[1,384], index: 3, kind: input, shape index: {}]   ;;  %s2384_s4 = inlined_call_operand.hbm [shape: bf16[2,10,384], index: 4, kind: output, shape index: {0}]   ;;  %s2385_s5 = inlined_call_operand.hbm [shape: f32[2,3,8,2], index: 5, kind: output, shape index: {1}]  }
   0x1   :  { %2410 = sst [smem:[#allocation30_spill]] %s2380_s0 }
   0x2   :  { %2411 = sst [smem:[#allocation31_spill]] %s2381_s1 }
   0x3   :  { %2412 = sst [smem:[#allocation32_spill]] %s2382_s2 }
   0x4   :  { %2413 = sst [smem:[#allocation33_spill]] %s2383_s3 }
   0x5   :  { %2414 = sst [smem:[#allocation34_spill]] %s2384_s4 }
   0x6   :  { %2415 = sst [smem:[#allocation35_spill]] %s2385_s5 }
   0x7   :  { %11 = vsyncpa [#allocation3], 0 }
   0x8   :  { %13 = vsyncpa [#allocation3 + $0x1], 0 }
   0x9   :  { %14 = vsyncpa [#allocation6], 0 }
   0xa   :  { %16 = vsyncpa [#allocation6 + $0x1], 0 }
   0xb   :  { %17 = vsyncpa [#allocation9], 0 }
   0xc   :  { %19 = vsyncpa [#allocation9 + $0x1], 0 }
   0xd   :  { %20 = vsyncpa [#allocation4], 0 }
   0xe   :  { %22 = vsyncpa [#allocation4 + $0x1], 0 }
   0xf   :  { %23 = vsyncpa [#allocation12], 0 }
  0x10   :  { %25 = vsyncpa [#allocation12 + $0x1], 0  ;;  %s1855_s18 = smov 0   ;;  %s1857_s19 = smov 0  }
  0x11   :  { %s1859_s20 = smov 0   ;;  %s1861_s21 = smov 0  }
  0x12   :  { %s1863_s22 = smov 0   ;;  %s1865_s23 = smov 0  }
  0x13   :  { %s1867_s24 = smov 0   ;;  %s1869_s25 = smov 0  }
  0x14   :  { %s1871_s26 = smov 0   ;;  %s1873_s27 = smov 0  }
  0x15   :  { %s1875_s28 = smov 0   ;;  %s1877_s29 = smov 0  }
  0x16   :  { %s1879_s30 = smov 0   ;;  %s1881_s6 = smov 0  }
  0x17 LB: > { %2416 = sst [smem:[#allocation19_spill]] %s1750_s18  ;;  %s1926_s7 = sadd.s32 4294967295, %s1802_s6   ;;  %s1802_s6 = sphi %s1881_s6, %s31_s6   ;;  %s1798_s30 = sphi %s1879_s30, %s2472_s30   ;;  %s1794_s29 = sphi %s1877_s29, %s2482_s29   ;;  %s1790_s28 = sphi %s1875_s28, %s2470_s28   ;;  %s1786_s27 = sphi %s1873_s27, %s2469_s27   ;;  %s1782_s26 = sphi %s1871_s26, %s2481_s26   ;;  %s1778_s25 = sphi %s1869_s25, %s2480_s25   ;;  %s1774_s24 = sphi %s1867_s24, %s2479_s24   ;;  %s1770_s23 = sphi %s1865_s23, %s2478_s23   ;;  %s1766_s22 = sphi %s1863_s22, %s2477_s22   ;;  %s1762_s21 = sphi %s1861_s21, %s2476_s21   ;;  %s1758_s20 = sphi %s1859_s20, %s2475_s20   ;;  %s1754_s19 = sphi %s1857_s19, %s2474_s19   ;;  %s1750_s18 = sphi %s1855_s18, %s2473_s18  }
  0x18   : > { %2417 = sst [smem:[#allocation20_spill]] %s1786_s27  ;;  %p1168_p0 = scmp.ge.s32.totalorder %s1802_s6, 1 }
  0x19   : > { %2418 = sst [smem:[#allocation21_spill]] %s1790_s28  ;;  %p2387_p1 = scmp.eq.s32.totalorder %s1926_s7, 0 }
  0x1a   : > { %2419 = sst [smem:[#allocation22_spill]] %s1794_s29  ;;  %p209_p2 = scmp.lt.s32.totalorder %s1802_s6, 7 }
  0x1b   : > { %2420 = sst [smem:[#allocation23_spill]] %s1798_s30  ;;  %s1804_s9 = smov [#allocation7]  }
  0x1c   : > { %p1931_p3 = pnand %p1168_p0, %p209_p2  ;;  %s221_s10 = sshll.u32 %s1804_s9, 4  ;;  %s222_s10 = int_to_ptr.vmem [resolvable:$true] %s221_s10 }
  0x1d   : > { %s2424_s2 = sld [smem:[#allocation32_spill]] }
  0x1e   : > { %s2421_s8 = scalar_select %p1931_p3, 1, 0 }
  0x1f   : > { %p1331_p4 = pneg %p1931_p3 }
  0x20   : > { %2422 = sst [smem:[#allocation24_spill]] %s2421_s8 }
  0x21   : > { %p1939_p5 = pnand %p1331_p4, %p2387_p1 }
  0x23   : > { %s1493_s14 = scalar_lea.hbm %s2424_s2, 1152  ;;  %p1495_p7 = pneg %p1939_p5 }
  0x24   : > { %p1494_p6 = scmp.ne.s32.totalorder %s2424_s2, %s1493_s14  ;;  %p1500_p10 = scmp.lt.u32.totalorder %s1493_s14, %s2424_s2 }
  0x26   : > { %p1496_p8 = pnand %p1495_p7, %p1494_p6 }
  0x28   : > { %p1497_p9 = pneg %p1496_p8 }
  0x2a   : > { %p1502_p11 = pnand %p1500_p10, %p1497_p9 }
  0x2c   : > { %1505 = shalt.err (!%p1502_p11)
}
  0x2d   : > { %s1506_s5 = scalar_lea.vmem %s222_s10, 1152  ;;  %p1514_p2 = scmp.lt.s32.totalorder %s222_s10, %s222_s10 }
  0x2e   : > { %p1507_p12 = scmp.ne.s32.totalorder %s222_s10, %s1506_s5  ;;  %p1515_p4 = scmp.lt.s32.totalorder %s1506_s5, %s1506_s5 }
  0x30   : > { %p1509_p13 = pnand %p1507_p12, %p1495_p7  ;;  %p1516_p1 = por %p1515_p4, %p1514_p2 }
  0x32   : > { %p1510_p0 = pneg %p1509_p13 }
  0x34   : > { %p1517_p3 = pnand %p1516_p1, %p1510_p0 }
  0x36   : > { %1520 = shalt.err (!%p1517_p3)
}
  0x37   : > { %s1805_s12 = smov 64   ;;  %s1806_s5 = smov 4  }
  0x38   : > { %1334 = dma.hbm_to_vmem [thread:$0]  (!%p1939_p5), %s2424_s2, 1152, %s222_s10, [#allocation6], %s1805_s12, %s1805_s12, %s1806_s5  }
  0x39   : > { %s1167_s15 = sadd.s32 4294967294, %s1802_s6   ;;  %s40_s16 = sadd.s32 1, %s1794_s29 }
  0x3a   : > { %s43_s17 = sadd.s32 1, %s1798_s30  ;;  %p41_p1 = scmp.ge.s32.totalorder %s40_s16, 3 }
  0x3b   : > { %s52_s9 = sadd.s32 1, %s1782_s26  ;;  %p59_p3 = scmp.ne.s32.totalorder %s1782_s26, %s1778_s25 }
  0x3c   : > { %p2402_p6 = scmp.eq.s32.totalorder %s1802_s6, 0  ;;  %s2484_s17 = smov (!%p41_p1, %s43_s17), %s1798_s30 }
  0x3d   : > { %s1966_s4 = scalar_select %p41_p1, 0, %s40_s16  }
  0x3e   : > { %p1978_p5 = por %p2402_p6, %p59_p3  ;;  %p45_p7 = scmp.ge.s32.totalorder %s2484_s17, 2 }
  0x3f   : > { %2425 = sst [smem:[#allocation25_spill]] %s1966_s4  ;;  %s1971_s10 = ssub.s32 %s1794_s29, %s1966_s4 }
  0x40   : > { %p65_p8 = scmp.ne.s32.totalorder %s1778_s25, %s1774_s24  ;;  %s76_s12 = sadd.s32 1, %s1966_s4 }
  0x41   : > { %s2486_s17 = smov (%p45_p7, %s2484_s17), 0  ;;  %p2428_p10 = scmp.eq.s32.totalorder %s1926_s7, 0 }
  0x42   : > { %2427 = sst [smem:[#allocation26_spill]] %s2486_s17  ;;  %s78_s13 = ssub.s32 %s40_s16, %s76_s12 }
  0x43   : > { %p1993_p11 = por %p2428_p10, %p65_p8  ;;  %s47_s14 = ssub.s32 %s1798_s30, %s2486_s17 }
  0x44   : > { %p168_p12 = scmp.eq.s32.totalorder %s1926_s7, 5  ;;  %s49_s2 = sor.u32 %s1971_s10, %s47_s14 }
  0x45   : > { %s2429_s5 = scalar_select %p1993_p11, 1, 0 }
  0x46   : > { %s79_s27 = sor.u32 %s78_s13, %s47_s14  ;;  %p50_p13 = scmp.eq.s32.totalorder %s49_s2, 0 }
  0x47   : > { %2430 = sst [smem:[#allocation27_spill]] %s2429_s5  ;;  %p2001_p0 = scmp.eq.s32.totalorder %s79_s27, 0 }
  0x48   : > { %p2008_p2 = por %p168_p12, %p59_p3  ;;  %p174_p4 = scmp.eq.s32.totalorder %s1167_s15, 5 }
  0x49   : > { %s2013_s5 = scalar_select %p50_p13, %s1782_s26, %s52_s9  }
  0x4a   : > { %s2432_s28 = scalar_select %p2008_p2, 1, 0 }
  0x4b   : > { %2434 = sst [smem:[#allocation29_spill]] %s2013_s5  ;;  %p2018_p1 = por %p174_p4, %p65_p8 }
  0x4c   : > { %2433 = sst [smem:[#allocation28_spill]] %s2432_s28  ;;  %p2401_p7 = scmp.lt.s32.totalorder %s1802_s6, 6 }
  0x4d   : > { %s2435_s16 = scalar_select %p2018_p1, 1, 0 }
  0x4e   : > { %s235_s2 = sand.u32 1, %s1782_s26   ;;  %s1172_s12 = sshll.u32 %s1798_s30, 2 }
  0x4f   : > { %s1171_s27 = sshll.u32 %s235_s2, 1  ;;  %s244_s13 = sadd.s32 %s1794_s29, %s1172_s12 }
  0x50   : > { %s1173_s14 = sshll.u32 %s244_s13, 5  ;;  %s239_s17 = scalar_lea.vmem [#allocation2], %s1171_s27 }
  0x51   : > { %s248_s8 = sshll.u32 %s239_s17, 4  ;;  %s2436_s0 = sld [smem:[#allocation30_spill]]  ;;  %s2031_s8 = int_to_ptr.vmem [resolvable:$true] %s248_s8 }
  0x52   : > { %p2037_p3 = pnand %p2401_p7, %p1978_p5  ;;  %s2438_s1 = sld [smem:[#allocation31_spill]] }
  0x53   : > { %s236_s18 = scalar_lea.sflag [#allocation3], %s235_s2 }
  0x54   : > { %p1523_p10 = pneg %p2037_p3 }
  0x57   : > { %s2029_s28 = scalar_lea.hbm %s2436_s0, %s1173_s14  ;;  %s1526_s13 = scalar_lea.hbm %s2436_s0, 256 }
  0x58   : > { %s2044_s3 = scalar_lea.hbm %s2438_s1, %s1173_s14  ;;  %s1521_s17 = scalar_lea.hbm %s2029_s28, 32 }
  0x59   : > { %p1522_p8 = scmp.ne.s32.totalorder %s2029_s28, %s1521_s17  ;;  %p1527_p5 = scmp.lt.u32.totalorder %s2029_s28, %s2436_s0 }
  0x5a   : > { %p1528_p4 = scmp.lt.u32.totalorder %s1526_s13, %s1521_s17  ;;  %p1530_p7 = scmp.lt.u32.totalorder %s1521_s17, %s2029_s28 }
  0x5b   : > { %p1524_p12 = pnand %p1523_p10, %p1522_p8 }
  0x5c   : > { %p1529_p9 = por %p1528_p4, %p1527_p5 }
  0x5d   : > { %p1525_p13 = pneg %p1524_p12 }
  0x5e   : > { %p1531_p6 = por %p1530_p7, %p1529_p9 }
  0x60   : > { %p1532_p1 = pnand %p1531_p6, %p1525_p13 }
  0x62   : > { %1535 = shalt.err (!%p1532_p1)
}
  0x63   : > { %s1536_s2 = scalar_lea.vmem %s2031_s8, 32  ;;  %s1807_s14 = smov [#allocation2]  }
  0x64   : > { %p1537_p8 = scmp.ne.s32.totalorder %s2031_s8, %s1536_s2  ;;  %s1541_s9 = sshll.u32 %s1807_s14, 4  ;;  %s1542_s9 = int_to_ptr.vmem [resolvable:$false] %s1541_s9 }
  0x65   : > { %s1543_s30 = scalar_lea.vmem %s1542_s9, 64  ;;  %p1544_p11 = scmp.lt.s32.totalorder %s2031_s8, %s1542_s9 }
  0x66   : > { %p1539_p12 = pnand %p1537_p8, %p1523_p10  ;;  %p1545_p5 = scmp.lt.s32.totalorder %s1543_s30, %s1536_s2 }
  0x68   : > { %p1540_p2 = pneg %p1539_p12  ;;  %p1546_p4 = por %p1545_p5, %p1544_p11 }
  0x6a   : > { %p1547_p9 = pnand %p1546_p4, %p1540_p2 }
  0x6c   : > { %1550 = shalt.err (!%p1547_p9)
}
  0x6d   : > { %1338 = dma.hbm_to_vmem [thread:$0]  (!%p2037_p3), %s2029_s28, 32, %s2031_s8, %s236_s18  }
  0x6e   : > { %s82_s5 = sadd.s32 1, %s1770_s23  ;;  %p89_p6 = scmp.ne.s32.totalorder %s1770_s23, %s1766_s22 }
  0x6f   : > { %s2075_s15 = scalar_select %p2001_p0, %s1770_s23, %s82_s5  }
  0x70   : > { %p95_p11 = scmp.ne.s32.totalorder %s1766_s22, %s1762_s21  ;;  %s255_s12 = sand.u32 1, %s1802_s6  }
  0x71   : > { %s257_s17 = sand.u32 1, %s1770_s23   ;;  %p2439_p2 = scmp.eq.s32.totalorder %s1802_s6, 0 }
  0x72   : > { %p2440_p7 = scmp.eq.s32.totalorder %s1926_s7, 0  ;;  %s1174_s27 = sshll.u32 %s257_s17, 1 }
  0x73   : > { %p91_p1 = por %p89_p6, %p2439_p2  ;;  %s2092_s13 = scalar_lea.hbm %s2044_s3, 32 }
  0x74   : > { %p2087_p10 = por %p95_p11, %p2440_p7  ;;  %s259_s4 = scalar_lea.vmem [#allocation5], %s1174_s27 }
  0x75   : > { %s269_s28 = sshll.u32 %s259_s4, 4  ;;  %p2442_p0 = scmp.lt.s32.totalorder %s1802_s6, 6  ;;  %s2100_s28 = int_to_ptr.vmem [resolvable:$true] %s269_s28 }
  0x76   : > { %s256_s8 = scalar_lea.sflag [#allocation6], %s255_s12  ;;  %s1581_s18 = scalar_lea.hbm %s2044_s3, 64 }
  0x77   : > { %p2096_p3 = pnand %p2442_p0, %p91_p1  ;;  %p1552_p13 = scmp.ne.s32.totalorder %s2092_s13, %s1581_s18 }
  0x78   : > { %s1556_s9 = scalar_lea.hbm %s2438_s1, 256  ;;  %p1557_p4 = scmp.lt.u32.totalorder %s2092_s13, %s2438_s1 }
  0x79   : > { %p1553_p8 = pneg %p2096_p3  ;;  %p1558_p9 = scmp.lt.u32.totalorder %s1556_s9, %s1581_s18 }
  0x7a   : > { %p1560_p11 = scmp.lt.u32.totalorder %s1581_s18, %s2092_s13 }
  0x7b   : > { %p1554_p12 = pnand %p1553_p8, %p1552_p13  ;;  %p1559_p6 = por %p1558_p9, %p1557_p4 }
  0x7d   : > { %p1555_p5 = pneg %p1554_p12  ;;  %p1561_p2 = por %p1560_p11, %p1559_p6 }
  0x7f   : > { %p1562_p1 = pnand %p1561_p2, %p1555_p5 }
  0x81   : > { %1565 = shalt.err (!%p1562_p1)
}
  0x82   : > { %s1566_s3 = scalar_lea.vmem %s2100_s28, 32  ;;  %s1808_s12 = smov [#allocation5]  }
  0x83   : > { %p1567_p7 = scmp.ne.s32.totalorder %s2100_s28, %s1566_s3  ;;  %s1571_s17 = sshll.u32 %s1808_s12, 4  ;;  %s1572_s17 = int_to_ptr.vmem [resolvable:$false] %s1571_s17 }
  0x84   : > { %s1573_s27 = scalar_lea.vmem %s1572_s17, 64  ;;  %p1574_p12 = scmp.lt.s32.totalorder %s2100_s28, %s1572_s17 }
  0x85   : > { %p1569_p0 = pnand %p1567_p7, %p1553_p8  ;;  %p1575_p4 = scmp.lt.s32.totalorder %s1573_s27, %s1566_s3 }
  0x87   : > { %p1570_p13 = pneg %p1569_p0  ;;  %p1576_p9 = por %p1575_p4, %p1574_p12 }
  0x89   : > { %p1577_p6 = pnand %p1576_p9, %p1570_p13 }
  0x8b   : > { %1580 = shalt.err (!%p1577_p6)
}
  0x8c   : > { %s2444_s4 = sld [smem:[#allocation19_spill]]  ;;  %s129_s18 = sadd.s32 1, %s1758_s20 }
  0x8d   : > { %1341 = dma.hbm_to_vmem [thread:$0]  (!%p2096_p3), %s2092_s13, 32, %s2100_s28, %s256_s8  }
  0x8e   : > { %p136_p8 = scmp.ne.s32.totalorder %s1758_s20, %s1754_s19  ;;  %p2445_p5 = scmp.eq.s32.totalorder %s1971_s10, 0 }
  0x8f   : > { %p2446_p11 = scmp.eq.s32.totalorder %s1802_s6, 0  ;;  %s276_s21 = sand.u32 1, %s1758_s20  }
  0x90   : > { %s2133_s2 = scalar_select %p2445_p5, %s1758_s20, %s129_s18  }
  0x91   : > { %p138_p2 = por %p136_p8, %p2446_p11  ;;  %s1177_s14 = sshll.u32 %s1794_s29, 4 }
  0x92   : > { %p142_p1 = scmp.ne.s32.totalorder %s1754_s19, %s2444_s4  ;;  %p2447_p7 = scmp.eq.s32.totalorder %s1926_s7, 0 }
  0x93   : > { %s2449_s3 = sld [smem:[#allocation33_spill]]  ;;  %s279_s10 = scalar_lea.vmem [#allocation8], %s276_s21 }
  0x94   : > { %p2143_p0 = por %p142_p1, %p2447_p7  ;;  %s286_s13 = sshll.u32 %s279_s10, 4  ;;  %s2158_s13 = int_to_ptr.vmem [resolvable:$true] %s286_s13 }
  0x95   : > { %p2450_p3 = scmp.lt.s32.totalorder %s1802_s6, 6  ;;  %s277_s8 = scalar_lea.sflag [#allocation9], %s276_s21 }
  0x96   : > { %s2448_s9 = scalar_select %p2143_p0, 1, 0 }
  0x97   : > { %p2154_p13 = pnand %p2450_p3, %p138_p2 }
  0x99   : > { %s2150_s12 = scalar_lea.hbm %s2449_s3, %s1177_s14  ;;  %p1584_p4 = pneg %p2154_p13 }
  0x9a   : > { %s1582_s17 = scalar_lea.hbm %s2150_s12, 16  ;;  %s1587_s18 = scalar_lea.hbm %s2449_s3, 48 }
  0x9b   : > { %p1583_p12 = scmp.ne.s32.totalorder %s2150_s12, %s1582_s17  ;;  %p1588_p8 = scmp.lt.u32.totalorder %s2150_s12, %s2449_s3 }
  0x9c   : > { %p1589_p5 = scmp.lt.u32.totalorder %s1587_s18, %s1582_s17  ;;  %p1591_p2 = scmp.lt.u32.totalorder %s1582_s17, %s2150_s12 }
  0x9d   : > { %p1585_p9 = pnand %p1584_p4, %p1583_p12 }
  0x9e   : > { %p1590_p11 = por %p1589_p5, %p1588_p8 }
  0x9f   : > { %p1586_p6 = pneg %p1585_p9 }
  0xa0   : > { %p1592_p1 = por %p1591_p2, %p1590_p11 }
  0xa2   : > { %p1593_p7 = pnand %p1592_p1, %p1586_p6 }
  0xa4   : > { %1596 = shalt.err (!%p1593_p7)
}
  0xa5   : > { %s1597_s21 = scalar_lea.vmem %s2158_s13, 16  ;;  %s1809_s5 = smov [#allocation8]  }
  0xa6   : > { %p1598_p3 = scmp.ne.s32.totalorder %s2158_s13, %s1597_s21  ;;  %s1602_s10 = sshll.u32 %s1809_s5, 4  ;;  %s1603_s10 = int_to_ptr.vmem [resolvable:$false] %s1602_s10 }
  0xa7   : > { %s1604_s27 = scalar_lea.vmem %s1603_s10, 32  ;;  %p1605_p0 = scmp.lt.s32.totalorder %s2158_s13, %s1603_s10 }
  0xa8   : > { %p1600_p12 = pnand %p1598_p3, %p1584_p4  ;;  %p1606_p8 = scmp.lt.s32.totalorder %s1604_s27, %s1597_s21 }
  0xaa   : > { %p1601_p9 = pneg %p1600_p12  ;;  %p1607_p5 = por %p1606_p8, %p1605_p0 }
  0xac   : > { %p1608_p11 = pnand %p1607_p5, %p1601_p9 }
  0xae   : > { %1611 = shalt.err (!%p1608_p11)
}
  0xaf   : > { %1344 = dma.hbm_to_vmem [thread:$0]  (!%p2154_p13), %s2150_s12, 16, %s2158_s13, %s277_s8  }
  0xb0   : > { %s2452_s17 = sld [smem:[#allocation24_spill]] }
  0xb6   : > { %p2453_p6 = scmp.ne.s32.totalorder %s2452_s17, 0 }
  0xb7   : > { %s2454_s4 = sld [smem:[#allocation27_spill]] (!%p2453_p6)  ;;  %s2188_s18 = sand.u32 (!%p2453_p6), 1, %s1778_s25  }
  0xb8   : > { %295 = sbr.rel (%p2453_p6) target bundleno = 752 (0x2f0), region = 36  ;;  %s1179_s14 = sshll.u32 (!%p2453_p6), %s2188_s18, 1 }
  0xb9   : > { %s298_s30 = scalar_lea.sflag (!%p2453_p6), [#allocation3], %s2188_s18  ;;  %s301_s21 = scalar_lea.vmem (!%p2453_p6), [#allocation2], %s1179_s14 }
  0xbd   : > { %p2455_p0 = scmp.ne.s32.totalorder (!%p2453_p6), %s2454_s4, 0 }
  0xbf   : > { %1725 = dma.done.wait (%p2455_p0), %s298_s30, 32  }
  0xc0   : > { %1727 = vsyncadd (%p2455_p0), %s298_s30, 4294967264  ;;  %s306_s12 = sand.u32 1, %s1926_s7   ;;  %s308_s13 = sand.u32 1, %s1766_s22  }
  0xc1   : > { %s1180_s28 = sshll.u32 %s308_s13, 1  ;;  %s307_s8 = scalar_lea.sflag [#allocation6], %s306_s12 }
  0xc2   : > { %s310_s5 = scalar_lea.vmem [#allocation5], %s1180_s28 }
  0xc3   : > { %1729 = dma.done.wait (%p2087_p10), %s307_s8, 32  }
  0xc4   : > { %1731 = vsyncadd (%p2087_p10), %s307_s8, 4294967264  ;;  %p2456_p13 = scmp.eq.s32.totalorder %s1926_s7, 0 }
  0xc6   : > { %1733 = dma.done.wait (%p2456_p13), [#allocation6], 1152   ;;  %p2457_p4 = pmov %p2456_p13 }
  0xc7   : > { %s319_s10 = sand.u32 1, %s1754_s19   ;;  %p2458_p2 = scmp.ne.s32.totalorder %s2448_s9, 0 }
  0xc8   : > { %1735 = vsyncadd (%p2457_p4), [#allocation6], 4294966144  ;;  %s320_s27 = scalar_lea.sflag [#allocation9], %s319_s10  ;;  %s2207_s17 = scalar_lea.vmem [#allocation8], %s319_s10 }
  0xc9   : > { %1737 = dma.done.wait (%p2458_p2), %s320_s27, 16  }
  0xca   : > { %1739 = vsyncadd (%p2458_p2), %s320_s27, 4294967280  ;;  %v1810_v0 = vmov 0.0   ;;  %vm1811_vm0 = vmmov 0   ;;  %v365_v1 = vld [vmem:[%s301_s21] sm:$0x3]  ;;  %s1812_s7 = smov 127  }
  0xcb   : > { %1231 = vmatprep.subr.bf16.mxu1 %v1810_v0  ;;  %1255 = vmatprep.subr.bf16.mxu0 %v1810_v0  ;;  %s1813_s11 = smov 109   ;;  %v366_v2 = vld [vmem:[%s310_s5] sm:$0x3]  ;;  %s1814_s9 = smov 108   ;;  %vm383_vm1 = vcmask 1039360   ;;  %vm624_vm2 = vcmask 891904  }
  0xcc   : > { %1233 = vmatprep.mubr.msk.bf16.mxu1 %vm1811_vm0, %v1810_v0  ;;  %1257 = vmatprep.mubr.msk.bf16.mxu0 %vm1811_vm0, %v1810_v0  ;;  %s1815_s4 = smov 92   ;;  %s1816_s14 = smov 126   ;;  %vm389_vm3 = vcmask 1041408   ;;  %vm687_vm4 = vcmask 883712   ;;  %v1484_v11 = vld [vmem:[#allocation7 + $0x8] sm:$0x1f]  }
  0xcd   : > { %379 = vrot.lane.b32.xlu1 %v365_v1, %s1812_s7  ;;  %620 = vrot.lane.b32.xlu0 %v365_v1, %s1813_s11  ;;  %s1817_s30 = smov 91   ;;  %s1818_s21 = smov 110   ;;  %v1485_v12 = vld [vmem:[#allocation7 + $0x20] sm:$0x1f]   ;;  %vm385_vm5 = vcmask 31744   ;;  %v443_v15 = vsel %vm389_vm3, %v365_v1, 0 }
  0xce   : > { %s1819_s12 = smov 90   ;;  %vm750_vm6 = vcmask 752640   ;;  %vm498_vm7 = vcmask 1031168   ;;  %v1486_v24 = vld [vmem:[#allocation7] sm:$0x1f]   ;;  %vm813_vm8 = vcmask 744448  }
  0xcf   : > { %v1487_v25 = vld [vmem:[#allocation7 + $0x28] sm:$0x1f]   ;;  %vm561_vm9 = vcmask 900096   ;;  %v1488_v34 = vld [vmem:[#allocation7 + $0x10] sm:$0x1f]   ;;  %vm876_vm10 = vcmask 736256  }
  0xd0   : > { %v1489_v35 = vld [vmem:[#allocation7 + $0x30] sm:$0x1f]   ;;  %v1490_v41 = vld [vmem:[#allocation7 + $0x18] sm:$0x1f]   ;;  %v1492_v44 = vld [vmem:[#allocation7 + $0x40] sm:$0x1f]  }
  0xd1   : > { %381 = vrot.lane.b32.xlu1 %v366_v2, %s1812_s7  ;;  %622 = vrot.lane.b32.xlu0 %v366_v2, %s1813_s11  ;;  %v1491_v42 = vld [vmem:[#allocation7 + $0x38] sm:$0x1f]   ;;  %s2406_s13 = sshll.u32 %s2188_s18, 3  ;;  %s2459_s28 = sld [smem:[#allocation21_spill]] }
  0xd2   : > { %v1202_v50 = vld [vmem:[%s2207_s17] ss:$0 sm:$0xff]  ;;  %s2460_s8 = sld [smem:[#allocation20_spill]]  ;;  %s2461_s5 = sld [smem:[#allocation28_spill]] }
  0xd3   : > { %s355_s10 = scalar_lea.vmem [#allocation10], %s2406_s13 }
  0xd4   : > { %s974_s27 = sshll.u32 %s355_s10, 4  ;;  %s2263_s27 = int_to_ptr.vmem [resolvable:$true] %s974_s27 }
  0xd5   : > { %685 = vrot.lane.b32.xlu1 %v366_v2, %s1814_s9  ;;  %683 = vrot.lane.b32.xlu0 %v365_v1, %s1814_s9 }
  0xd7   : > { %s1315_s17 = smul.u32 6, %s2459_s28 }
  0xd8   : > { %p2463_p1 = scmp.ne.s32.totalorder %s2461_s5, 0 }
  0xd9   : > { %748 = vrot.lane.b32.xlu1 %v366_v2, %s1815_s4  ;;  %746 = vrot.lane.b32.xlu0 %v365_v1, %s1815_s4  ;;  %s971_s7 = sadd.s32 %s2460_s8, %s1315_s17 }
  0xda   : > { %s1207_s11 = sshll.u32 %s971_s7, 6 }
  0xdd   : > { %496 = vrot.lane.b32.xlu1 %v366_v2, %s1816_s14  ;;  %494 = vrot.lane.b32.xlu0 %v365_v1, %s1816_s14  ;;  %s2462_s14 = sld [smem:[#allocation34_spill]] }
  0xe1   : > { %811 = vrot.lane.b32.xlu1 %v366_v2, %s1817_s30  ;;  %809 = vrot.lane.b32.xlu0 %v365_v1, %s1817_s30 }
  0xe3   : > { %s2269_s30 = scalar_lea.hbm %s2462_s14, %s1207_s11 }
  0xe5   : > { %559 = vrot.lane.b32.xlu1 %v366_v2, %s1818_s21  ;;  %557 = vrot.lane.b32.xlu0 %v365_v1, %s1818_s21  ;;  %s955_s21 = scalar_lea.sflag [#allocation4], %s2188_s18 }
  0xe9   : > { %874 = vrot.lane.b32.xlu1 %v366_v2, %s1819_s12  ;;  %872 = vrot.lane.b32.xlu0 %v365_v1, %s1819_s12  ;;  %s1612_s12 = scalar_lea.vmem %s2263_s27, 128 }
  0xea   : > { %p1613_p10 = scmp.ne.s32.totalorder %s2263_s27, %s1612_s12 }
  0xec   : > { %p1614_p7 = pnand %p1613_p10, %p2463_p1 }
  0xee   : > { %p1615_p3 = pneg %p1614_p7 }
 0x13f   : > { %v380_v3 = vpop.permute.xlu1 %379  ;;  %v621_v4 = vpop.permute.xlu0 %620 }
 0x143   : > { %v382_v5 = vpop.permute.xlu1 %381  ;;  %v623_v6 = vpop.permute.xlu0 %622 }
 0x144   : > { %v384_v7 = vsel %vm383_vm1, %v380_v3, %v382_v5  ;;  %v625_v8 = vsel %vm624_vm2, %v621_v4, %v623_v6 }
 0x145   : > { %v391_v9 = vsel %vm389_vm3, %v384_v7, 0  ;;  %v630_v10 = vsel %vm389_vm3, %v625_v8, 0 }
 0x146   : > { %1232 = vmatpush3.bf16.msra.mxu1 %v391_v9  ;;  %1256 = vmatpush3.bf16.msra.mxu0 %v630_v10 }
 0x147   : > { %v686_v13 = vpop.permute.xlu1 %685  ;;  %v684_v14 = vpop.permute.xlu0 %683  ;;  %1261 = vmatprep.subr.bf16.mxu0 %v1810_v0  ;;  %1237 = vmatprep.subr.bf16.mxu1 %v1810_v0 }
 0x148   : > { %v688_v16 = vsel %vm687_vm4, %v684_v14, %v686_v13 }
 0x149   : > { %v693_v17 = vsel %vm389_vm3, %v688_v16, 0  ;;  %1234 = vmatmul.mubr.msk.bf16.vlgmr.msra.gmra.mrb[0].mxu1 %vm385_vm5, %v1484_v11  ;;  %1258 = vmatmul.mubr.msk.bf16.vlgmr.msra.gmra.mrb[0].mxu0 %vm385_vm5, %v1485_v12 }
 0x14a   : > { %1262 = vmatpush3.bf16.msra.mxu0 %v693_v17  ;;  %1238 = vmatpush3.bf16.msra.mxu1 %v443_v15 }
 0x14b   : > { %v749_v18 = vpop.permute.xlu1 %748  ;;  %v747_v19 = vpop.permute.xlu0 %746  ;;  %1239 = vmatprep.mubr.msk.bf16.mxu1 %vm1811_vm0, %v1810_v0  ;;  %1263 = vmatprep.mubr.msk.bf16.mxu0 %vm1811_vm0, %v1810_v0 }
 0x14c   : > { %1267 = vmatprep.subr.bf16.mxu0 %v1810_v0  ;;  %1243 = vmatprep.subr.bf16.mxu1 %v1810_v0  ;;  %v751_v22 = vsel %vm750_vm6, %v747_v19, %v749_v18 }
 0x14d   : > { %v756_v26 = vsel %vm389_vm3, %v751_v22, 0 }
 0x14f   : > { %v497_v20 = vpop.permute.xlu1 %496  ;;  %v495_v21 = vpop.permute.xlu0 %494 }
 0x150   : > { %v499_v23 = vsel %vm498_vm7, %v495_v21, %v497_v20 }
 0x151   : > { %v504_v27 = vsel %vm389_vm3, %v499_v23, 0 }
 0x153   : > { %v812_v28 = vpop.permute.xlu1 %811  ;;  %v810_v29 = vpop.permute.xlu0 %809 }
 0x154   : > { %v814_v32 = vsel %vm813_vm8, %v810_v29, %v812_v28 }
 0x155   : > { %1240 = vmatmul.mubr.msk.bf16.vlgmr.msra.gmra.mrb[0].mxu1 %vm385_vm5, %v1486_v24  ;;  %1264 = vmatmul.mubr.msk.bf16.vlgmr.msra.gmra.mrb[0].mxu0 %vm385_vm5, %v1487_v25  ;;  %v819_v36 = vsel %vm389_vm3, %v814_v32, 0 }
 0x156   : > { %1268 = vmatpush3.bf16.msra.mxu0 %v756_v26  ;;  %1244 = vmatpush3.bf16.msra.mxu1 %v504_v27 }
 0x157   : > { %1245 = vmatprep.mubr.msk.bf16.mxu1 %vm1811_vm0, %v1810_v0  ;;  %1269 = vmatprep.mubr.msk.bf16.mxu0 %vm1811_vm0, %v1810_v0  ;;  %v560_v30 = vpop.permute.xlu1 %559  ;;  %v558_v31 = vpop.permute.xlu0 %557 }
 0x158   : > { %1273 = vmatprep.subr.bf16.mxu0 %v1810_v0  ;;  %1249 = vmatprep.subr.bf16.mxu1 %v1810_v0  ;;  %v562_v33 = vsel %vm561_vm9, %v558_v31, %v560_v30 }
 0x159   : > { %v567_v37 = vsel %vm389_vm3, %v562_v33, 0 }
 0x15b   : > { %v875_v38 = vpop.permute.xlu1 %874  ;;  %v873_v39 = vpop.permute.xlu0 %872 }
 0x15c   : > { %v877_v40 = vsel %vm876_vm10, %v873_v39, %v875_v38 }
 0x15d   : > { %v882_v43 = vsel %vm389_vm3, %v877_v40, 0 }
 0x161   : > { %1246 = vmatmul.mubr.msk.bf16.vlgmr.msra.gmra.mrb[0].mxu1 %vm385_vm5, %v1488_v34  ;;  %1270 = vmatmul.mubr.msk.bf16.vlgmr.msra.gmra.mrb[0].mxu0 %vm385_vm5, %v1489_v35 }
 0x162   : > { %1274 = vmatpush3.bf16.msra.mxu0 %v819_v36  ;;  %1250 = vmatpush3.bf16.msra.mxu1 %v567_v37 }
 0x163   : > { %1251 = vmatprep.mubr.msk.bf16.mxu1 %vm1811_vm0, %v1810_v0  ;;  %1275 = vmatprep.mubr.msk.bf16.mxu0 %vm1811_vm0, %v1810_v0 }
 0x164   : > { %1279 = vmatprep.subr.bf16.mxu0 %v1810_v0 }
 0x16d   : > { %1252 = vmatmul.mubr.msk.bf16.vlgmr.msra.gmra.mrb[0].mxu1 %vm385_vm5, %v1490_v41  ;;  %1276 = vmatmul.mubr.msk.bf16.vlgmr.msra.gmra.mrb[0].mxu0 %vm385_vm5, %v1491_v42 }
 0x16e   : > { %1280 = vmatpush3.bf16.msra.mxu0 %v882_v43  ;;  %1281 = vmatprep.mubr.msk.bf16.mxu0 %vm1811_vm0, %v1810_v0 }
 0x179   : > { %1282 = vmatmul.mubr.msk.bf16.vlgmr.msra.gmra.mrb[0].mxu0 %vm385_vm5, %v1492_v44 }
 0x240   : > { %v603_v45 = vpop.f32.mrb[0].mxu1 }
 0x241   : > { %v1253_v46 = vpop.f32.mrb[1].mxu1 }
 0x242   : > { %v606_v47 = vpop.f32.mrb[2].mxu1 }
 0x243   : > { %v1254_v48 = vpop.f32.mrb[3].mxu1 }
 0x24c   : > { %v918_v49 = vpop.f32.mrb[0].mxu0 }
 0x24d   : > { %v1285_v51 = vadd.f32 %v918_v49, %v603_v45  ;;  %v1283_v52 = vpop.f32.mrb[1].mxu0 }
 0x24e   : > { %v921_v53 = vpop.f32.mrb[2].mxu0 }
 0x24f   : > { %v1211_v54 = vpack.c.bf16 %v1285_v51, %v1285_v51  ;;  %v1286_v55 = vadd.f32 %v921_v53, %v606_v47  ;;  %v1284_v56 = vpop.f32.mrb[3].mxu0  ;;  %v934_v57 = vmul.f32 %v1285_v51, %v1202_v50 }
 0x251   : > { %v1212_v58 = vpack.c.bf16 %v1286_v55, %v1286_v55  ;;  %952 = vst [vmem:[%s355_s10] sm:$0xf] %v1211_v54  ;;  %935 = vadd.xlane.f32.xlu0 %v934_v57  ;;  %v937_v59 = vmul.f32 %v1285_v51, %v934_v57 }
 0x253   : > { %953 = vst [vmem:[%s355_s10 + $0x4] sm:$0x1] %v1212_v58  ;;  %938 = vadd.xlane.f32.xlu1 %v937_v59  ;;  %s1820_s10 = smov [#allocation10]  }
 0x254   : > { %s1616_s13 = sshll.u32 %s1820_s10, 4  ;;  %s1617_s13 = int_to_ptr.vmem [resolvable:$false] %s1616_s13 }
 0x255   : > { %s1618_s0 = scalar_lea.vmem %s1617_s13, 256  ;;  %p1619_p12 = scmp.lt.s32.totalorder %s2263_s27, %s1617_s13 }
 0x256   : > { %p1620_p9 = scmp.lt.s32.totalorder %s1618_s0, %s1612_s12 }
 0x258   : > { %p1621_p8 = por %p1620_p9, %p1619_p12 }
 0x25a   : > { %p1622_p5 = pnand %p1621_p8, %p1615_p3 }
 0x25c   : > { %1625 = shalt.err (!%p1622_p5)
}
 0x25d   : > { %s1626_s17 = scalar_lea.hbm %s2269_s30, 128  ;;  %s1630_s9 = scalar_lea.hbm %s2462_s14, 768 }
 0x25e   : > { %p1627_p11 = scmp.ne.s32.totalorder %s2269_s30, %s1626_s17  ;;  %p1631_p13 = scmp.lt.u32.totalorder %s2269_s30, %s2462_s14 }
 0x25f   : > { %p1632_p4 = scmp.lt.u32.totalorder %s1630_s9, %s1626_s17  ;;  %p1634_p10 = scmp.lt.u32.totalorder %s1626_s17, %s2269_s30 }
 0x260   : > { %p1628_p6 = pnand %p1627_p11, %p2463_p1 }
 0x261   : > { %p1633_p2 = por %p1632_p4, %p1631_p13 }
 0x262   : > { %p1629_p0 = pneg %p1628_p6 }
 0x263   : > { %p1635_p7 = por %p1634_p10, %p1633_p2 }
 0x265   : > { %p1636_p3 = pnand %p1635_p7, %p1629_p0 }
 0x267   : > { %1639 = shalt.err (!%p1636_p3)
}
 0x268   : > { %s1821_s0 = smov 64   ;;  %s1822_s12 = smov 192   ;;  %vm940_vm11 = vcmask 7168   ;;  %vm942_vm12 = vcmask 15360  }
 0x269   : > { %s1823_s10 = smov 4   ;;  %s1316_s7 = smul.u32 3, %s2459_s28 }
 0x26a   : > { %1327 = dma.vmem_to_hbm [thread:$0]  (%p2463_p1), %s2263_s27, 128, %s2269_s30, %s955_s21, %s1821_s0, %s1822_s12, %s1823_s10  }
 0x26b   : > { %s988_s17 = sadd.s32 %s2460_s8, %s1316_s7  ;;  %s2464_s9 = sshll.u32 %s2188_s18, 3 }
 0x26c   : > { %s1208_s11 = sshll.u32 %s988_s17, 7  ;;  %s362_s4 = scalar_lea.vmem [#allocation11], %s2464_s9 }
 0x26d   : > { %s992_s13 = sshll.u32 %s362_s4, 4  ;;  %s2465_s14 = sld [smem:[#allocation35_spill]]  ;;  %s2304_s13 = int_to_ptr.vmem [resolvable:$true] %s992_s13 }
 0x26e   : > { %s960_s28 = scalar_lea.sflag [#allocation12], %s2188_s18  ;;  %s1640_s8 = scalar_lea.vmem %s2304_s13, 128 }
 0x26f   : > { %p1641_p12 = scmp.ne.s32.totalorder %s2304_s13, %s1640_s8  ;;  %s1824_s27 = smov [#allocation11]  }
 0x270   : > { %s1644_s30 = sshll.u32 %s1824_s27, 4  ;;  %s1645_s30 = int_to_ptr.vmem [resolvable:$false] %s1644_s30 }
 0x271   : > { %p1642_p9 = pnand %p1641_p12, %p2463_p1  ;;  %s1646_s21 = scalar_lea.vmem %s1645_s30, 256 }
 0x272   : > { %p1647_p5 = scmp.lt.s32.totalorder %s2304_s13, %s1645_s30  ;;  %p1648_p11 = scmp.lt.s32.totalorder %s1646_s21, %s1640_s8 }
 0x273   : > { %s2302_s29 = scalar_lea.hbm %s2465_s14, %s1208_s11  ;;  %p1643_p8 = pneg %p1642_p9 }
 0x274   : > { %p1649_p6 = por %p1648_p11, %p1647_p5 }
 0x276   : > { %p1650_p0 = pnand %p1649_p6, %p1643_p8 }
 0x2de   : > { %v936_v60 = vpop.xlane.xlu0 %935 }
 0x2e0   : > { %v939_v61 = vpop.xlane.xlu1 %938 }
 0x2e1   : > { %v941_v62 = vsel %vm940_vm11, %v936_v60, %v939_v61 }
 0x2e2   : > { %943 = vst.msk [vmem:[%s362_s4] sm:$0xff] %vm942_vm12, %v941_v62 }
 0x2e3   : > { %1653 = shalt.err (!%p1650_p0)
}
 0x2e4   : > { %s1654_s1 = scalar_lea.hbm %s2302_s29, 128  ;;  %s1658_s0 = scalar_lea.hbm %s2465_s14, 768 }
 0x2e5   : > { %p1655_p13 = scmp.ne.s32.totalorder %s2302_s29, %s1654_s1  ;;  %p1659_p10 = scmp.lt.u32.totalorder %s2302_s29, %s2465_s14 }
 0x2e6   : > { %p1660_p7 = scmp.lt.u32.totalorder %s1658_s0, %s1654_s1  ;;  %p1662_p12 = scmp.lt.u32.totalorder %s1654_s1, %s2302_s29 }
 0x2e7   : > { %p1656_p4 = pnand %p1655_p13, %p2463_p1 }
 0x2e8   : > { %p1661_p3 = por %p1660_p7, %p1659_p10 }
 0x2e9   : > { %p1657_p2 = pneg %p1656_p4 }
 0x2ea   : > { %p1663_p9 = por %p1662_p12, %p1661_p3 }
 0x2ec   : > { %p1664_p8 = pnand %p1663_p9, %p1657_p2 }
 0x2ee   : > { %1667 = shalt.err (!%p1664_p8)
}
 0x2ef   : > { %1328 = dma.vmem_to_hbm [thread:$0]  (%p2463_p1), %s2304_s13, 128, %s2302_s29, %s960_s28  }
 0x2f0 PF: > { %p1355_p5 = scmp.ge.s32.totalorder %s1802_s6, 2  ;;  %s1004_s7 = sand.u32 1, %s1774_s24  }
 0x2f1   : > { %p2466_p11 = scmp.ne.s32.totalorder %s2435_s16, 0  ;;  %s1005_s17 = scalar_lea.sflag [#allocation4], %s1004_s7 }
 0x2f3   : > { %p1346_p6 = pnand %p1355_p5, %p2466_p11 }
 0x2f5   : > { %1741 = dma.done.wait (!%p1346_p6), %s1005_s17, 128  }
 0x2f6   : > { %1743 = vsyncadd (!%p1346_p6), %s1005_s17, 4294967168  ;;  %s1014_s11 = scalar_lea.sflag [#allocation12], %s1004_s7 }
 0x2f7   : > { %1745 = dma.done.wait (!%p1346_p6), %s1014_s11, 128  }
 0x2f8   : > { %1747 = vsyncadd (!%p1346_p6), %s1014_s11, 4294967168  ;;  %s31_s6 = sadd.s32 1, %s1802_s6   ;;  %s2468_s29 = sld [smem:[#allocation29_spill]] }
 0x2f9   : > { %p2333_p0 = scmp.ge.s32.totalorder %s31_s6, 8   ;;  %s2469_s27 = sld [smem:[#allocation22_spill]] }
 0x2fa   : > { %s2470_s28 = sld [smem:[#allocation23_spill]]  ;;  %s2471_s16 = sld [smem:[#allocation25_spill]] }
 0x2fb   : > { %s2472_s30 = sld [smem:[#allocation26_spill]]  ;;  %s2473_s18 = smov %s1754_s19 }
 0x2fc   : > { %s2474_s19 = smov %s1758_s20  ;;  %s2475_s20 = smov %s2133_s2 }
 0x2fd   : > { %s2476_s21 = smov %s1766_s22  ;;  %s2477_s22 = smov %s1770_s23 }
 0x2fe   : > { %s2478_s23 = smov %s2075_s15  ;;  %s2479_s24 = smov %s1778_s25 }
 0x2ff   : > { %s2480_s25 = smov %s1782_s26  ;;  %s2481_s26 = smov %s2468_s29 }
 0x300   : > { %s2482_s29 = smov %s2471_s16  ;;  %30 = sbr.rel (!%p2333_p0) target bundleno = 23 (0x17), region = 136 }
 0x307   :  { %1019 = vsyncpa [#allocation3], 1 }
 0x308   :  { %1021 = vsyncpa [#allocation3 + $0x1], 1 }
 0x309   :  { %1022 = vsyncpa [#allocation6], 1 }
 0x30a   :  { %1024 = vsyncpa [#allocation6 + $0x1], 1 }
 0x30b   :  { %1025 = vsyncpa [#allocation9], 1 }
 0x30c   :  { %1027 = vsyncpa [#allocation9 + $0x1], 1 }
 0x30d   :  { %1028 = vsyncpa [#allocation4], 1 }
 0x30e   :  { %1030 = vsyncpa [#allocation4 + $0x1], 1 }
 0x30f   :  { %1031 = vsyncpa [#allocation12], 1 }
 0x310   :  { %1033 = vsyncpa [#allocation12 + $0x1], 1 }

</bundles_post_ra>
